<compile_context>
chip_gen: v5e
topology: v5e:2x2
jax: 0.10.0
libtpu: 0.0.40
codegen_flags: <defaults>
</compile_context>

<pallas_src>
import numpy as np
import jax
import jax.numpy as jnp
from jax import lax
from jax.experimental import pallas as pl
from jax.experimental.pallas import tpu as pltpu


def _fm_cross_kernel(wT_ref, rsn_ref, idxT_ref, o_ref):
    """Fused embedding-gather + FM second-order cross for one batch tile.

    wT_ref  : (D, V)   transposed embedding table, VMEM-resident across the grid
    rsn_ref : (V, 1)   per-row squared L2 norm of the table, VMEM-resident
    idxT_ref: (F, TB)  int32 absolute row ids (batch on the 128-lane axis)
    o_ref   : (1, 1, TB) float32 output (lane-dense, batch on lanes)
    """
    num_fields, tb = idxT_ref.shape
    _, v_dim = wT_ref.shape

    idx = idxT_ref[...]                                           # (F, TB) int32
    iota_v = lax.broadcasted_iota(jnp.int32, (v_dim, tb), 0)      # rows on sublanes

    # counts[v, b] = #fields of batch element b selecting table row v (0/1 here,
    # fields map to disjoint id ranges).  This is the gather, expressed as data
    # for a single MXU matmul — pure VPU compares/adds to build, no HBM traffic.
    counts = (iota_v == idx[0:1, :]).astype(jnp.float32)
    for f in range(1, num_fields):                                # F small: unroll
        counts = counts + (iota_v == idx[f:f + 1, :]).astype(jnp.float32)

    # S[d, b] = sum_f W[idx[b, f], d]   (one MXU matmul, f32 accumulation)
    s_t = jnp.dot(wT_ref[...], counts,
                  preferred_element_type=jnp.float32)             # (D, TB)

    # sum_f ||e_{b,f}||^2 = sum_v counts[v, b] * ||W[v, :]||^2  (VPU mul + XLU reduce)
    sum_of_square = jnp.sum(rsn_ref[...] * counts, axis=0, keepdims=True)   # (1, TB)
    square_of_sum = jnp.sum(s_t * s_t, axis=0, keepdims=True)               # (1, TB)

    o_ref[...] = (0.5 * (square_of_sum - sum_of_square)).reshape(1, 1, tb)


def fm_cross_pallas(weight, idx, *, batch_tile=128):
    """FM second-order cross with the embedding gather fused into the kernel.

    weight: (V, D) float32 embedding table (assumed to fit in VMEM — typical FM).
    idx   : (B, F) int32 absolute row ids (field offsets already added).
    returns (B, 1) float32, matching the PyTorch keepdim reduction.
    """
    # TODO(synk): for embedding tables too large to keep VMEM-resident, switch to
    # a manual per-row pltpu.make_async_copy DMA gather with double buffering.
    assert batch_tile % 128 == 0, "batch tile must be lane-dense (multiple of 128)"
    b_dim, f_dim = idx.shape
    v_dim, d_dim = weight.shape

    # Pad vocab rows to a sublane multiple (pad rows are never selected).
    v_pad = (-v_dim) % 8
    if v_pad:
        weight = jnp.pad(weight, ((0, v_pad), (0, 0)))
    v_full = v_dim + v_pad

    # Pad batch to a whole number of lane-dense tiles (pad rows use id 0, discarded).
    tb = batch_tile
    grid_b = pl.cdiv(b_dim, tb)
    b_full = grid_b * tb
    if b_full != b_dim:
        idx = jnp.pad(idx, ((0, b_full - b_dim), (0, 0)))

    # One-time table prep (tiny; read from HBM once, kept resident by constant index_map).
    w_t = jnp.transpose(weight).astype(jnp.float32)                          # (D, V)
    rsn = jnp.sum(weight.astype(jnp.float32) ** 2, axis=1, keepdims=True)    # (V, 1)
    idx_t = jnp.transpose(idx).astype(jnp.int32)                             # (F, B_full)

    out = pl.pallas_call(
        _fm_cross_kernel,
        out_shape=jax.ShapeDtypeStruct((grid_b, 1, tb), jnp.float32),
        grid_spec=pltpu.PrefetchScalarGridSpec(
            num_scalar_prefetch=0,
            grid=(grid_b,),
            in_specs=[
                pl.BlockSpec((d_dim, v_full), lambda b: (0, 0)),   # resident table
                pl.BlockSpec((v_full, 1), lambda b: (0, 0)),       # resident row norms
                pl.BlockSpec((f_dim, tb), lambda b: (0, b)),       # per-tile ids
            ],
            out_specs=pl.BlockSpec((1, 1, tb), lambda b: (b, 0, 0)),
        ),
        compiler_params=pltpu.CompilerParams(
            dimension_semantics=("parallel",)),
    )(w_t, rsn, idx_t)

    return out.reshape(b_full, 1)[:b_dim]


class FMCrossJax:
    """JAX/Pallas port of the PyTorch FMCross module."""

    def __init__(self, field_nums, emd_dims, key):
        num_emb = int(sum(field_nums))
        # xavier_uniform_ on an Embedding weight of shape (num_emb, emd_dims):
        # fan_in = emd_dims, fan_out = num_emb -> bound = sqrt(6 / (fan_in + fan_out))
        bound = float(np.sqrt(6.0 / (num_emb + emd_dims)))
        # Kept float32 to match the PyTorch module's numerics; the kernel's f32
        # accumulation path also supports bf16 tables (halve HBM bytes) if desired.
        self.weight = jax.random.uniform(
            key, (num_emb, emd_dims), dtype=jnp.float32,
            minval=-bound, maxval=bound)
        self.init_index = jnp.asarray(
            np.array((0, *np.cumsum(field_nums)[:-1]), dtype=np.int64),
            dtype=jnp.int32)

    def __call__(self, x):
        # x: int32 [B, F] per-field indices; offset into the shared table (tiny glue op).
        idx = x.astype(jnp.int32) + self.init_index[None, :]
        return fm_cross_pallas(idx=idx, weight=self.weight)        # [B, 1]


def _reference(weight, init_index, x):
    idx = x + init_index[None, :]
    emds = jnp.take(weight, idx, axis=0)
    square_of_sum = jnp.sum(emds, axis=1) ** 2
    sum_of_square = jnp.sum(emds ** 2, axis=1)
    return 0.5 * jnp.sum(square_of_sum - sum_of_square, axis=1, keepdims=True)


if __name__ == "__main__":
    key = jax.random.PRNGKey(0)
    k_w, k_x = jax.random.split(key)

    field_nums = (3, 5, 4, 6)   # 4 fields, 18 total embedding rows
    emd_dims = 32
    batch = 256                 # 2 lane-dense tiles of 128 -> grid=(2,) "parallel"

    model = FMCrossJax(field_nums, emd_dims, k_w)

    # per-field categorical indices in [0, field_nums[f])
    cols = []
    for f, n in enumerate(field_nums):
        kf = jax.random.fold_in(k_x, f)
        cols.append(jax.random.randint(kf, (batch,), 0, n, dtype=jnp.int32))
    x = jnp.stack(cols, axis=1)   # [B, F] int32

    out = jax.block_until_ready(model(x))

    ref = _reference(model.weight, model.init_index, x)
    np.testing.assert_allclose(np.asarray(out), np.asarray(ref),
                               rtol=1e-4, atol=1e-4)
    assert out.shape == (batch, 1)
    print("KERNEL_OK")
</pallas_src>

<mosaic_0001>
module attributes {stable_mosaic.version = 11 : i64} {
  func.func @_fm_cross_kernel(%arg0: i32, %arg1: memref<32x24xf32, #tpu.memory_space<vmem>>, %arg2: memref<24x1xf32, #tpu.memory_space<vmem>>, %arg3: memref<4x128xi32, #tpu.memory_space<vmem>>, %arg4: memref<1x1x128xf32, #tpu.memory_space<vmem>>) attributes {dimension_semantics = [#tpu.dimension_semantics<parallel>], iteration_bounds = array<i64: 2>, scalar_prefetch = 0 : i64, scratch_operands = 0 : i64, tpu.core_type = #tpu.core_type<tc>, window_params = [{pipeline_mode = #tpu.pipeline_mode<synchronous>, transform_indices = @transform_0, window_bounds = array<i64: 32, 24>}, {pipeline_mode = #tpu.pipeline_mode<synchronous>, transform_indices = @transform_1, window_bounds = array<i64: 24, 1>}, {transform_indices = @transform_2, window_bounds = array<i64: 4, 128>}, {transform_indices = @transform_3, window_bounds = array<i64: 1, 1, 128>}]} {
    %c0 = arith.constant 0 : index
    %c0_0 = arith.constant 0 : index
    %0 = vector.load %arg3[%c0, %c0_0] : memref<4x128xi32, #tpu.memory_space<vmem>>, vector<4x128xi32>
    %1 = tpu.iota {dimensions = array<i32: 0>} : vector<24x128xi32>
    %2 = vector.extract_strided_slice %0 {offsets = [0, 0], sizes = [1, 128], strides = [1, 1]} : vector<4x128xi32> to vector<1x128xi32>
    %3 = vector.broadcast %2 : vector<1x128xi32> to vector<24x128xi32>
    %4 = arith.cmpi eq, %1, %3 : vector<24x128xi32>
    %5 = arith.extui %4 : vector<24x128xi1> to vector<24x128xi32>
    %6 = arith.sitofp %5 : vector<24x128xi32> to vector<24x128xf32>
    %7 = vector.extract_strided_slice %0 {offsets = [1, 0], sizes = [1, 128], strides = [1, 1]} : vector<4x128xi32> to vector<1x128xi32>
    %8 = vector.broadcast %7 : vector<1x128xi32> to vector<24x128xi32>
    %9 = arith.cmpi eq, %1, %8 : vector<24x128xi32>
    %10 = arith.extui %9 : vector<24x128xi1> to vector<24x128xi32>
    %11 = arith.sitofp %10 : vector<24x128xi32> to vector<24x128xf32>
    %12 = arith.addf %6, %11 : vector<24x128xf32>
    %13 = vector.extract_strided_slice %0 {offsets = [2, 0], sizes = [1, 128], strides = [1, 1]} : vector<4x128xi32> to vector<1x128xi32>
    %14 = vector.broadcast %13 : vector<1x128xi32> to vector<24x128xi32>
    %15 = arith.cmpi eq, %1, %14 : vector<24x128xi32>
    %16 = arith.extui %15 : vector<24x128xi1> to vector<24x128xi32>
    %17 = arith.sitofp %16 : vector<24x128xi32> to vector<24x128xf32>
    %18 = arith.addf %12, %17 : vector<24x128xf32>
    %19 = vector.extract_strided_slice %0 {offsets = [3, 0], sizes = [1, 128], strides = [1, 1]} : vector<4x128xi32> to vector<1x128xi32>
    %20 = vector.broadcast %19 : vector<1x128xi32> to vector<24x128xi32>
    %21 = arith.cmpi eq, %1, %20 : vector<24x128xi32>
    %22 = arith.extui %21 : vector<24x128xi1> to vector<24x128xi32>
    %23 = arith.sitofp %22 : vector<24x128xi32> to vector<24x128xf32>
    %24 = arith.addf %18, %23 : vector<24x128xf32>
    %c0_1 = arith.constant 0 : index
    %c0_2 = arith.constant 0 : index
    %25 = vector.load %arg1[%c0_1, %c0_2] : memref<32x24xf32, #tpu.memory_space<vmem>>, vector<32x24xf32>
    %cst = arith.constant dense<0.000000e+00> : vector<32x128xf32>
    %26 = tpu.matmul %25, %24, %cst {dimension_numbers = #tpu.dot_dimension_numbers<[1], [0], [0], [1], [0, 0, 1, 1], [], []>} : vector<32x24xf32>, vector<24x128xf32>, vector<32x128xf32> -> vector<32x128xf32>
    %c0_3 = arith.constant 0 : index
    %c0_4 = arith.constant 0 : index
    %27 = vector.load %arg2[%c0_3, %c0_4] : memref<24x1xf32, #tpu.memory_space<vmem>>, vector<24x1xf32>
    %28 = vector.broadcast %27 : vector<24x1xf32> to vector<24x128xf32>
    %29 = arith.mulf %28, %24 : vector<24x128xf32>
    %cst_5 = arith.constant dense<0.000000e+00> : vector<128xf32>
    %30 = vector.multi_reduction <add>, %29, %cst_5 [0] : vector<24x128xf32> to vector<128xf32>
    %31 = vector.shape_cast %30 : vector<128xf32> to vector<1x128xf32>
    %32 = arith.mulf %26, %26 : vector<32x128xf32>
    %cst_6 = arith.constant dense<0.000000e+00> : vector<128xf32>
    %33 = vector.multi_reduction <add>, %32, %cst_6 [0] : vector<32x128xf32> to vector<128xf32>
    %34 = vector.shape_cast %33 : vector<128xf32> to vector<1x128xf32>
    %35 = arith.subf %34, %31 : vector<1x128xf32>
    %cst_7 = arith.constant 5.000000e-01 : f32
    %36 = vector.broadcast %cst_7 : f32 to vector<1x128xf32>
    %37 = arith.mulf %36, %35 : vector<1x128xf32>
    %38 = vector.shape_cast %37 : vector<1x128xf32> to vector<1x1x128xf32>
    %c0_8 = arith.constant 0 : index
    %c0_9 = arith.constant 0 : index
    %c0_10 = arith.constant 0 : index
    %39 = vector.load %arg4[%c0_8, %c0_9, %c0_10] : memref<1x1x128xf32, #tpu.memory_space<vmem>>, vector<1x1x128xf32>
    tpu.vector_store %arg4[%c0_8, %c0_9, %c0_10], %38 {strides = array<i32>} : memref<1x1x128xf32, #tpu.memory_space<vmem>>, vector<1x1x128xf32>,
    return
  }
  func.func @transform_0(%arg0: i32) -> (i32, i32) {
    %c0_i32 = arith.constant 0 : i32
    %c0_i32_0 = arith.constant 0 : i32
    %c0_i32_1 = arith.constant 0 : i32
    return %c0_i32, %c0_i32_0 : i32, i32
  }
  func.func @transform_1(%arg0: i32) -> (i32, i32) {
    %c0_i32 = arith.constant 0 : i32
    %c0_i32_0 = arith.constant 0 : i32
    %c0_i32_1 = arith.constant 0 : i32
    return %c0_i32, %c0_i32_0 : i32, i32
  }
  func.func @transform_2(%arg0: i32) -> (i32, i32) {
    %c0_i32 = arith.constant 0 : i32
    %c0_i32_0 = arith.constant 0 : i32
    return %c0_i32, %arg0 : i32, i32
  }
  func.func @transform_3(%arg0: i32) -> (i32, i32, i32) {
    %c0_i32 = arith.constant 0 : i32
    %c0_i32_0 = arith.constant 0 : i32
    %c0_i32_1 = arith.constant 0 : i32
    return %arg0, %c0_i32, %c0_i32_0 : i32, i32, i32
  }
}

</mosaic_0001>

<bundles_post_ra>
// kernel: tpu_custom_call.1
= control target key start
LH: loop header
LB: loop body
LE: loop exit
PB: predicated region body
PF: predicated region fallthrough
CT: control target
= control target key end

     0   :  { %8 = vsyncpa [#allocation3], 0  ;;  %s645_s0 = inlined_call_operand.vmem [shape: f32[32,24], index: 0, kind: input, shape index: {}]   ;;  %s646_s1 = inlined_call_operand.vmem [shape: f32[24,1], index: 1, kind: input, shape index: {}]   ;;  %s647_s2 = inlined_call_operand.vmem [shape: s32[4,256], index: 2, kind: input, shape index: {}]   ;;  %s648_s3 = inlined_call_operand.hbm [shape: f32[2,1,128], index: 3, kind: output, shape index: {}]  }
   0x1   :  { %10 = vsyncpa [#allocation3 + $0x1], 0  ;;  %s539_s12 = smov 0   ;;  %s541_s13 = smov 0  }
   0x2   :  { %s543_s14 = smov 0   ;;  %s545_s15 = smov 0  }
   0x3 LB: > { %s560_s16 = sadd.s32 4294967295, %s515_s15   ;;  %s378_s17 = sadd.s32 4294967294, %s515_s15   ;;  %s515_s15 = sphi %s545_s15, %s654_s15   ;;  %s511_s14 = sphi %s543_s14, %s653_s14   ;;  %s507_s13 = sphi %s541_s13, %s652_s13   ;;  %s503_s12 = sphi %s539_s12, %s651_s12  }
   0x4   : > { %s564_s18 = sadd.s32 1, %s515_s15   ;;  %s91_s19 = sadd.s32 1, %s511_s14 }
   0x5   : > { %s88_s20 = ssub.s32 %s515_s15, %s564_s18  ;;  %p101_p0 = scmp.ne.s32.totalorder %s511_s14, %s507_s13 }
   0x6   : > { %p89_p1 = scmp.eq.s32.totalorder %s88_s20, 0  ;;  %p102_p2 = scmp.eq.s32.totalorder %s560_s16, 1 }
   0x7   : > { %p107_p3 = scmp.ne.s32.totalorder %s507_s13, %s503_s12  ;;  %p108_p4 = scmp.eq.s32.totalorder %s378_s17, 1 }
   0x8   : > { %s575_s21 = scalar_select %p89_p1, %s511_s14, %s91_s19  }
   0x9   : > { %p577_p5 = por %p102_p2, %p101_p0  ;;  %p581_p6 = por %p108_p4, %p107_p3 }
   0xa   : > { %p381_p7 = scmp.ge.s32.totalorder %s515_s15, 1  ;;  %p139_p8 = scmp.lt.s32.totalorder %s515_s15, 3 }
   0xc   : > { %p140_p9 = pnand %p381_p7, %p139_p8 }
   0xd   : > { %p161_p10 = scmp.lt.s32.totalorder (!%p140_p9), %s560_s16, 1  ;;  %s159_s25 = sand.u32 (!%p140_p9), 1, %s507_s13  }
   0xe   : > { %143 = sbr.rel (%p140_p9) target bundleno = 197 (0xc5), region = 32  ;;  %s319_s28 = scalar_lea.hbm (!%p140_p9), %s648_s3, %s560_s16 }
   0xf   : > { %s323_s4 = sshll.u32 (!%p140_p9), %s319_s28, 4  ;;  %s473_s9 = scalar_lea.hbm (!%p140_p9), %s648_s3, 2  ;;  %s324_s4 = int_to_ptr.hbm [resolvable:$true] %s323_s4 }
  0x10   : > { %s467_s6 = sshra.s32 (!%p140_p9), %s324_s4, 4  ;;  %s468_s6 = int_to_ptr.hbm [resolvable:$true] %s467_s6 }
  0x11   : > { %s469_s7 = scalar_lea.hbm (!%p140_p9), %s468_s6, 1  ;;  %p474_p0 = scmp.lt.s32.totalorder (!%p140_p9), %s468_s6, %s648_s3 }
  0x12   : > { %p470_p11 = scmp.ne.s32.totalorder (!%p140_p9), %s468_s6, %s469_s7  ;;  %p475_p1 = scmp.lt.s32.totalorder (!%p140_p9), %s473_s9, %s469_s7 }
  0x13   : > { %v265_v0 = vld [vmem:[%s646_s1] sm:$0xff]  ;;  %v166_v1 = vlaneseq  ;;  %v517_v2 = vmov 0   ;;  %s162_s26 = scalar_select %p161_p10, %s560_s16, 1  ;;  %v267_v4 = vld [vmem:[%s646_s1 + $0x10] sm:$0xff]  ;;  %v266_v12 = vld [vmem:[%s646_s1 + $0x8] sm:$0xff]  ;;  %v518_v13 = vmov 0.0  }
  0x14   : > { %451 = vset.pattern.permute.xlu0 %v517_v2  ;;  %452 = vset.pattern.permute.xlu1 %v517_v2  ;;  %v221_v35 = vld [vmem:[%s645_s0 + $0x10] sm:$0xff]  ;;  %vm223_vm12 = vcmask 195584   ;;  %v222_v36 = vld [vmem:[%s645_s0 + $0x18] sm:$0xff]  ;;  %v219_v37 = vld [vmem:[%s645_s0] sm:$0xff]  ;;  %p471_p12 = pnand %p470_p11, %p577_p5  ;;  %p476_p2 = por %p475_p1, %p474_p0 }
  0x15   : > { %270 = vperm.xlu0 %451, %v265_v0   ;;  %v167_v3 = vshrl.u32 %v166_v1, 7  ;;  %280 = vperm.xlu1 %452, %v267_v4   ;;  %s382_s29 = sshll.u32 %s162_s26, 2  ;;  %v220_v38 = vld [vmem:[%s645_s0 + $0x8] sm:$0xff] }
  0x16   : > { %s164_s5 = scalar_lea.vmem %s647_s2, %s382_s29  ;;  %s160_s29 = scalar_lea.vmem [#allocation2], %s159_s25 }
  0x17   : > { %v169_v5 = vadd.s32 16, %v167_v3  ;;  %v165_v6 = vld [vmem:[%s164_s5] sm:$0xf]  ;;  %v168_v7 = vadd.s32 8, %v167_v3  ;;  %s321_s30 = sshll.u32 %s160_s29, 4  ;;  %s311_s5 = scalar_lea.sflag [#allocation3], %s159_s25  ;;  %s322_s30 = int_to_ptr.vmem [resolvable:$true] %s321_s30 }
  0x18   : > { %v170_v8 = vperm.slane %v165_v6, 0  ;;  %v180_v9 = vperm.slane %v165_v6, 1  ;;  %v193_v10 = vperm.slane %v165_v6, 2  ;;  %v206_v11 = vperm.slane %v165_v6, 3  ;;  %p472_p13 = pneg %p471_p12 }
  0x1a   : > { %vm173_vm0 = vcmp.eq.s32.totalorder %v169_v5, %v170_v8  ;;  %vm183_vm1 = vcmp.eq.s32.totalorder %v169_v5, %v180_v9  ;;  %vm196_vm2 = vcmp.eq.s32.totalorder %v169_v5, %v193_v10  ;;  %vm209_vm3 = vcmp.eq.s32.totalorder %v169_v5, %v206_v11  ;;  %p477_p3 = pnand %p476_p2, %p472_p13 }
  0x1b   : > { %v385_v14 = vsel %vm173_vm0, 1.0, %v518_v13  ;;  %v388_v15 = vsel %vm183_vm1, 1.0, %v518_v13  ;;  %v391_v16 = vsel %vm196_vm2, 1.0, %v518_v13  ;;  %v394_v17 = vsel %vm209_vm3, 1.0, %v518_v13 }
  0x1c   : > { %v192_v18 = vadd.f32 %v388_v15, %v385_v14  ;;  %vm172_vm4 = vcmp.eq.s32.totalorder %v168_v7, %v170_v8  ;;  %vm182_vm5 = vcmp.eq.s32.totalorder %v168_v7, %v180_v9  ;;  %vm195_vm6 = vcmp.eq.s32.totalorder %v168_v7, %v193_v10 }
  0x1d   : > { %275 = vperm.xlu0 %451, %v266_v12   ;;  %v384_v19 = vsel %vm172_vm4, 1.0, %v518_v13  ;;  %v387_v20 = vsel %vm182_vm5, 1.0, %v518_v13  ;;  %v390_v21 = vsel %vm195_vm6, 1.0, %v518_v13  ;;  %vm208_vm7 = vcmp.eq.s32.totalorder %v168_v7, %v206_v11 }
  0x1e   : > { %v205_v22 = vadd.f32 %v391_v16, %v192_v18  ;;  %v191_v23 = vadd.f32 %v387_v20, %v384_v19  ;;  %v393_v24 = vsel %vm208_vm7, 1.0, %v518_v13  ;;  %vm171_vm8 = vcmp.eq.s32.totalorder %v167_v3, %v170_v8 }
  0x1f   : > { %v383_v25 = vsel %vm171_vm8, 1.0, %v518_v13  ;;  %vm181_vm9 = vcmp.eq.s32.totalorder %v167_v3, %v180_v9  ;;  %vm194_vm10 = vcmp.eq.s32.totalorder %v167_v3, %v193_v10  ;;  %vm207_vm11 = vcmp.eq.s32.totalorder %v167_v3, %v206_v11 }
  0x20   : > { %v218_v26 = vadd.f32 %v394_v17, %v205_v22  ;;  %v204_v27 = vadd.f32 %v390_v21, %v191_v23  ;;  %v386_v28 = vsel %vm181_vm9, 1.0, %v518_v13  ;;  %v389_v29 = vsel %vm194_vm10, 1.0, %v518_v13 }
  0x21   : > { %v190_v30 = vadd.f32 %v386_v28, %v383_v25  ;;  %v392_v32 = vsel %vm207_vm11, 1.0, %v518_v13 }
  0x22   : > { %402 = vmatpush.msra.mxu2 %v218_v26  ;;  %403 = vmatpush.msra.mxu3 %v218_v26  ;;  %v217_v31 = vadd.f32 %v393_v24, %v204_v27 }
  0x23   : > { %249 = vmatpush.msra.mxu0 %v218_v26  ;;  %401 = vmatpush.msra.mxu1 %v218_v26  ;;  %v203_v33 = vadd.f32 %v389_v29, %v190_v30 }
  0x24   : > { %405 = vmatpush.msra.mxu2 %v217_v31  ;;  %406 = vmatpush.msra.mxu3 %v217_v31 }
  0x25   : > { %v216_v34 = vadd.f32 %v392_v32, %v203_v33  ;;  %250 = vmatpush.msra.mxu0 %v217_v31  ;;  %404 = vmatpush.msra.mxu1 %v217_v31 }
  0x27   : > { %408 = vmatpush.msra.mxu2 %v216_v34  ;;  %409 = vmatpush.msra.mxu3 %v216_v34 }
  0x28   : > { %397 = vmatmul.msk.f32.vlgmr.msra.gmra.mxu2 %vm223_vm12, %v221_v35  ;;  %398 = vmatmul.msk.f32.vlgmr.msra.gmra.mxu3 %vm223_vm12, %v222_v36 }
  0x29   : > { %251 = vmatpush.msra.mxu0 %v216_v34  ;;  %407 = vmatpush.msra.mxu1 %v216_v34 }
  0x2a   : > { %395 = vmatmul.msk.f32.vlgmr.msra.gmra.mxu0 %vm223_vm12, %v219_v37  ;;  %396 = vmatmul.msk.f32.vlgmr.msra.gmra.mxu1 %vm223_vm12, %v220_v38 }
  0x87   : > { %v271_v39 = vpop.permute.xlu0 %270  ;;  %v281_v43 = vpop.permute.xlu1 %280 }
  0x88   : > { %v283_v41 = vmul.f32 %v271_v39, %v216_v34  ;;  %v285_v45 = vmul.f32 %v281_v43, %v218_v26 }
  0x8f   : > { %v276_v40 = vpop.permute.xlu0 %275 }
  0x90   : > { %v284_v42 = vmul.f32 %v276_v40, %v217_v31 }
  0x92   : > { %v286_v44 = vadd.f32 %v284_v42, %v283_v41 }
  0x94   : > { %v287_v46 = vadd.f32 %v286_v44, %v285_v45 }
  0x96   : > { %v288_v49 = vrot.slane %v287_v46, 4 }
  0x98   : > { %v289_v55 = vadd.f32 %v288_v49, %v287_v46 }
  0x9a   : > { %v290_v59 = vrot.slane %v289_v55, 2 }
  0x9c   : > { %v291_v62 = vadd.f32 %v290_v59, %v289_v55 }
  0x9e   : > { %v292_v1 = vrot.slane %v291_v62, 1 }
  0xa0   : > { %v293_v5 = vadd.f32 %v292_v1, %v291_v62 }
  0xa7   : > { %v253_v47 = vpop.f32.mrf.mxu0  ;;  %v256_v48 = vpop.f32.mrf.mxu1 }
  0xa8   : > { %v294_v50 = vmul.f32 %v253_v47, %v253_v47  ;;  %v295_v51 = vmul.f32 %v256_v48, %v256_v48 }
  0xaa   : > { %v298_v52 = vadd.f32 %v295_v51, %v294_v50 }
  0xab   : > { %v259_v53 = vpop.f32.mrf.mxu2  ;;  %v262_v54 = vpop.f32.mrf.mxu3 }
  0xac   : > { %v296_v56 = vmul.f32 %v259_v53, %v259_v53  ;;  %v297_v57 = vmul.f32 %v262_v54, %v262_v54 }
  0xae   : > { %v299_v58 = vadd.f32 %v298_v52, %v296_v56 }
  0xb0   : > { %v300_v60 = vadd.f32 %v299_v58, %v297_v57 }
  0xb2   : > { %v301_v61 = vrot.slane %v300_v60, 4 }
  0xb4   : > { %v302_v63 = vadd.f32 %v301_v61, %v300_v60 }
  0xb6   : > { %v303_v0 = vrot.slane %v302_v63, 2 }
  0xb8   : > { %v304_v2 = vadd.f32 %v303_v0, %v302_v63 }
  0xba   : > { %v305_v3 = vrot.slane %v304_v2, 1 }
  0xbc   : > { %v306_v4 = vadd.f32 %v305_v3, %v304_v2 }
  0xbe   : > { %v307_v6 = vsub.f32 %v306_v4, %v293_v5 }
  0xc0   : > { %v308_v7 = vmul.f32 0.5, %v307_v6 }
  0xc2   : > { %309 = vst [vmem:[%s160_s29] sm:$0x1] %v308_v7 }
  0xc3   : > { %480 = shalt.err (!%p477_p3)
}
  0xc4   : > { %410 = dma.vmem_to_hbm [thread:$0]  (%p577_p5), %s322_s30, 16, %s324_s4, %s311_s5  }
  0xc5 PF: > { %p416_p4 = scmp.ge.s32.totalorder %s515_s15, 2  ;;  %s335_s17 = sand.u32 1, %s503_s12  }
  0xc6   : > { %s336_s19 = scalar_lea.sflag [#allocation3], %s335_s17 }
  0xc7   : > { %p413_p7 = pnand %p416_p4, %p581_p6 }
  0xc9   : > { %p414_p8 = pneg %p413_p7 }
  0xcb   : > { %498 = dma.done.wait (%p414_p8), %s336_s19, 16  }
  0xcc   : > { %500 = vsyncadd (%p414_p8), %s336_s19, 4294967280  ;;  %p13_p9 = scmp.ge.s32.totalorder %s564_s18, 4   ;;  %s651_s12 = smov %s507_s13 }
  0xcd   : > { %s652_s13 = smov %s511_s14  ;;  %s653_s14 = smov %s575_s21 }
  0xce   : > { %s654_s15 = smov %s564_s18  ;;  %15 = sbr.rel (!%p13_p9) target bundleno = 3 (0x3), region = 67 }
  0xd3   :  { %341 = vsyncpa [#allocation3], 1 }
  0xd4   :  { %343 = vsyncpa [#allocation3 + $0x1], 1 }

</bundles_post_ra>
